<compile_context>
chip_gen: v6e
topology: v6e:2x2x1
jax: 0.10.0
libtpu: 0.0.40
codegen_flags: <defaults>
</compile_context>

<pallas_src>
import functools

import jax
import jax.numpy as jnp
from jax.experimental import pallas as pl
from jax.experimental.pallas import tpu as pltpu


_DEFAULT_TILE_M = 512  # batch-tile (lane) width; multiple of 128


def _round_up(n, m):
    return ((n + m - 1) // m) * m


def _mlp_kernel(x_ref,
                w1_ref, b1_ref,
                w2_ref, b2_ref,
                w3_ref, b3_ref,
                w4_ref, b4_ref,
                o_ref):
    """Fused feature-major 4-layer MLP forward on one batch tile.

    x_ref: [4, TM], w_ref: [out, in], b_ref: [out, 1], o_ref: [2, TM].
    """
    tm = x_ref.shape[1]

    def layer(h, w_ref, b_ref, relu):
        out_f, in_f = w_ref.shape
        # Bias broadcast hoisted once per layer (lane broadcast of [out, 1]).
        acc = jnp.broadcast_to(b_ref[...], (out_f, tm))
        # VPU broadcast-FMA, unrolled over the tiny input-feature dim (4 or 16):
        #   acc[o, t] += w[o, k] * h[k, t]
        for k in range(in_f):
            acc = acc + w_ref[:, k:k + 1] * h[k:k + 1, :]
        return jnp.maximum(acc, 0.0) if relu else acc

    h = x_ref[...]
    h = layer(h, w1_ref, b1_ref, True)
    h = layer(h, w2_ref, b2_ref, True)
    h = layer(h, w3_ref, b3_ref, True)
    y = layer(h, w4_ref, b4_ref, False)
    o_ref[...] = y.astype(o_ref.dtype)


@functools.partial(jax.jit, static_argnames=("tile_m",))
def net_forward(x, params, tile_m=_DEFAULT_TILE_M):
    """x: [B, 4] float32.  params: dict of weights/biases.  Returns [B, 2] float32."""
    w1, b1 = params["w1"], params["b1"]
    w2, b2 = params["w2"], params["b2"]
    w3, b3 = params["w3"], params["b3"]
    w4, b4 = params["w4"], params["b4"]

    B, in_f = x.shape
    out_f = w4.shape[1]

    # Batch tile: multiple of 128 lanes, no larger than needed for small B.
    tm = min(tile_m, _round_up(max(B, 1), 128))
    b_pad = _round_up(B, tm)

    # Feature-major layout + zero padding of the batch tail (padded rows are sliced off).
    x_t = jnp.pad(x.astype(jnp.float32).T, ((0, 0), (0, b_pad - B)))
    w1f, b1f = w1.T, b1.T   # [16, 4],  [16, 1]
    w2f, b2f = w2.T, b2.T   # [16, 16], [16, 1]
    w3f, b3f = w3.T, b3.T   # [16, 16], [16, 1]
    w4f, b4f = w4.T, b4.T   # [2, 16],  [2, 1]

    grid = (b_pad // tm,)

    def const_spec(a):
        return pl.BlockSpec(a.shape, lambda i, nd=a.ndim: (0,) * nd)

    flops = 2 * b_pad * (4 * 16 + 16 * 16 + 16 * 16 + 16 * 2)
    bytes_accessed = 4 * (b_pad * (in_f + out_f)
                          + sum(int(p.size) for p in (w1, b1, w2, b2, w3, b3, w4, b4)))

    y_t = pl.pallas_call(
        _mlp_kernel,
        out_shape=jax.ShapeDtypeStruct((out_f, b_pad), jnp.float32),
        grid=grid,
        in_specs=[
            pl.BlockSpec((in_f, tm), lambda i: (0, i)),   # x tile (lane-dense)
            const_spec(w1f), const_spec(b1f),             # weights/biases: resident
            const_spec(w2f), const_spec(b2f),
            const_spec(w3f), const_spec(b3f),
            const_spec(w4f), const_spec(b4f),
        ],
        out_specs=pl.BlockSpec((out_f, tm), lambda i: (0, i)),
        compiler_params=pltpu.CompilerParams(
            dimension_semantics=("parallel",)),
        cost_estimate=pl.CostEstimate(
            flops=flops, transcendentals=0, bytes_accessed=bytes_accessed),
    )(x_t, w1f, b1f, w2f, b2f, w3f, b3f, w4f, b4f)

    return y_t[:, :B].T


def init_params(key):
    """Deterministic init mimicking nn.Linear's U(-1/sqrt(fan_in), 1/sqrt(fan_in)).

    Weights stored as [in_features, out_features]; biases as [1, out_features]
    (same convention as the previous version; the wrapper re-lays them out).
    """
    dims = [(4, 16), (16, 16), (16, 16), (16, 2)]
    params = {}
    keys = jax.random.split(key, 2 * len(dims))
    for i, (fan_in, fan_out) in enumerate(dims):
        bound = 1.0 / jnp.sqrt(jnp.float32(fan_in))
        w = jax.random.uniform(keys[2 * i], (fan_in, fan_out),
                               minval=-bound, maxval=bound, dtype=jnp.float32)
        b = jax.random.uniform(keys[2 * i + 1], (1, fan_out),
                               minval=-bound, maxval=bound, dtype=jnp.float32)
        params[f"w{i + 1}"] = w
        params[f"b{i + 1}"] = b
    return params


def _reference_forward(x, p):
    h = jnp.maximum(x @ p["w1"] + p["b1"], 0.0)
    h = jnp.maximum(h @ p["w2"] + p["b2"], 0.0)
    h = jnp.maximum(h @ p["w3"] + p["b3"], 0.0)
    return h @ p["w4"] + p["b4"]


if __name__ == "__main__":
    key = jax.random.PRNGKey(0)
    pkey, xkey, xkey2 = jax.random.split(key, 3)
    params = init_params(pkey)

    # Small-batch check (single grid step).
    batch = 8
    x = jax.random.normal(xkey, (batch, 4), dtype=jnp.float32)
    y = jax.block_until_ready(net_forward(x, params))
    y_ref = _reference_forward(x, params)
    assert y.shape == (batch, 2), y.shape
    assert jnp.allclose(y, y_ref, atol=1e-5, rtol=1e-5), "mismatch vs reference (B=8)"

    # Larger, non-multiple batch: exercises the grid, resident weights and tail padding.
    batch2 = 300
    x2 = jax.random.normal(xkey2, (batch2, 4), dtype=jnp.float32)
    y2 = jax.block_until_ready(net_forward(x2, params, tile_m=128))
    y2_ref = _reference_forward(x2, params)
    assert y2.shape == (batch2, 2), y2.shape
    assert jnp.allclose(y2, y2_ref, atol=1e-5, rtol=1e-5), "mismatch vs reference (B=300)"

    print("KERNEL_OK")
</pallas_src>

<mosaic_0001>
module attributes {stable_mosaic.version = 11 : i64} {
  func.func @_mlp_kernel(%arg0: i32, %arg1: memref<4x128xf32, #tpu.memory_space<vmem>>, %arg2: memref<16x4xf32, #tpu.memory_space<vmem>>, %arg3: memref<16x1xf32, #tpu.memory_space<vmem>>, %arg4: memref<16x16xf32, #tpu.memory_space<vmem>>, %arg5: memref<16x1xf32, #tpu.memory_space<vmem>>, %arg6: memref<16x16xf32, #tpu.memory_space<vmem>>, %arg7: memref<16x1xf32, #tpu.memory_space<vmem>>, %arg8: memref<2x16xf32, #tpu.memory_space<vmem>>, %arg9: memref<2x1xf32, #tpu.memory_space<vmem>>, %arg10: memref<2x128xf32, #tpu.memory_space<vmem>>) attributes {dimension_semantics = [#tpu.dimension_semantics<parallel>], iteration_bounds = array<i64: 1>, scalar_prefetch = 0 : i64, scratch_operands = 0 : i64, tpu.core_type = #tpu.core_type<tc>, window_params = [{transform_indices = @transform_0, window_bounds = array<i64: 4, 128>}, {pipeline_mode = #tpu.pipeline_mode<synchronous>, transform_indices = @transform_1, window_bounds = array<i64: 16, 4>}, {pipeline_mode = #tpu.pipeline_mode<synchronous>, transform_indices = @transform_2, window_bounds = array<i64: 16, 1>}, {pipeline_mode = #tpu.pipeline_mode<synchronous>, transform_indices = @transform_3, window_bounds = array<i64: 16, 16>}, {pipeline_mode = #tpu.pipeline_mode<synchronous>, transform_indices = @transform_4, window_bounds = array<i64: 16, 1>}, {pipeline_mode = #tpu.pipeline_mode<synchronous>, transform_indices = @transform_5, window_bounds = array<i64: 16, 16>}, {pipeline_mode = #tpu.pipeline_mode<synchronous>, transform_indices = @transform_6, window_bounds = array<i64: 16, 1>}, {pipeline_mode = #tpu.pipeline_mode<synchronous>, transform_indices = @transform_7, window_bounds = array<i64: 2, 16>}, {pipeline_mode = #tpu.pipeline_mode<synchronous>, transform_indices = @transform_8, window_bounds = array<i64: 2, 1>}, {transform_indices = @transform_9, window_bounds = array<i64: 2, 128>}]} {
    %c0 = arith.constant 0 : index
    %c0_0 = arith.constant 0 : index
    %0 = vector.load %arg1[%c0, %c0_0] : memref<4x128xf32, #tpu.memory_space<vmem>>, vector<4x128xf32>
    %c0_1 = arith.constant 0 : index
    %c0_2 = arith.constant 0 : index
    %1 = vector.load %arg3[%c0_1, %c0_2] : memref<16x1xf32, #tpu.memory_space<vmem>>, vector<16x1xf32>
    %2 = vector.shape_cast %1 : vector<16x1xf32> to vector<16x1xf32>
    %3 = vector.broadcast %2 : vector<16x1xf32> to vector<16x128xf32>
    %c0_3 = arith.constant 0 : index
    %c0_4 = arith.constant 0 : index
    %4 = vector.load %arg2[%c0_3, %c0_4] : memref<16x4xf32, #tpu.memory_space<vmem>>, vector<16x1xf32>
    %5 = vector.extract_strided_slice %0 {offsets = [0, 0], sizes = [1, 128], strides = [1, 1]} : vector<4x128xf32> to vector<1x128xf32>
    %6 = vector.broadcast %4 : vector<16x1xf32> to vector<16x128xf32>
    %7 = vector.broadcast %5 : vector<1x128xf32> to vector<16x128xf32>
    %8 = arith.mulf %6, %7 : vector<16x128xf32>
    %9 = arith.addf %3, %8 : vector<16x128xf32>
    %c0_5 = arith.constant 0 : index
    %c1 = arith.constant 1 : index
    %10 = vector.load %arg2[%c0_5, %c1] : memref<16x4xf32, #tpu.memory_space<vmem>>, vector<16x1xf32>
    %11 = vector.extract_strided_slice %0 {offsets = [1, 0], sizes = [1, 128], strides = [1, 1]} : vector<4x128xf32> to vector<1x128xf32>
    %12 = vector.broadcast %10 : vector<16x1xf32> to vector<16x128xf32>
    %13 = vector.broadcast %11 : vector<1x128xf32> to vector<16x128xf32>
    %14 = arith.mulf %12, %13 : vector<16x128xf32>
    %15 = arith.addf %9, %14 : vector<16x128xf32>
    %c0_6 = arith.constant 0 : index
    %c2 = arith.constant 2 : index
    %16 = vector.load %arg2[%c0_6, %c2] : memref<16x4xf32, #tpu.memory_space<vmem>>, vector<16x1xf32>
    %17 = vector.extract_strided_slice %0 {offsets = [2, 0], sizes = [1, 128], strides = [1, 1]} : vector<4x128xf32> to vector<1x128xf32>
    %18 = vector.broadcast %16 : vector<16x1xf32> to vector<16x128xf32>
    %19 = vector.broadcast %17 : vector<1x128xf32> to vector<16x128xf32>
    %20 = arith.mulf %18, %19 : vector<16x128xf32>
    %21 = arith.addf %15, %20 : vector<16x128xf32>
    %c0_7 = arith.constant 0 : index
    %c3 = arith.constant 3 : index
    %22 = vector.load %arg2[%c0_7, %c3] : memref<16x4xf32, #tpu.memory_space<vmem>>, vector<16x1xf32>
    %23 = vector.extract_strided_slice %0 {offsets = [3, 0], sizes = [1, 128], strides = [1, 1]} : vector<4x128xf32> to vector<1x128xf32>
    %24 = vector.broadcast %22 : vector<16x1xf32> to vector<16x128xf32>
    %25 = vector.broadcast %23 : vector<1x128xf32> to vector<16x128xf32>
    %26 = arith.mulf %24, %25 : vector<16x128xf32>
    %27 = arith.addf %21, %26 : vector<16x128xf32>
    %cst = arith.constant 0.000000e+00 : f32
    %28 = vector.broadcast %cst : f32 to vector<16x128xf32>
    %29 = arith.maximumf %27, %28 : vector<16x128xf32>
    %c0_8 = arith.constant 0 : index
    %c0_9 = arith.constant 0 : index
    %30 = vector.load %arg5[%c0_8, %c0_9] : memref<16x1xf32, #tpu.memory_space<vmem>>, vector<16x1xf32>
    %31 = vector.shape_cast %30 : vector<16x1xf32> to vector<16x1xf32>
    %32 = vector.broadcast %31 : vector<16x1xf32> to vector<16x128xf32>
    %c0_10 = arith.constant 0 : index
    %c0_11 = arith.constant 0 : index
    %33 = vector.load %arg4[%c0_10, %c0_11] : memref<16x16xf32, #tpu.memory_space<vmem>>, vector<16x1xf32>
    %34 = vector.extract_strided_slice %29 {offsets = [0, 0], sizes = [1, 128], strides = [1, 1]} : vector<16x128xf32> to vector<1x128xf32>
    %35 = vector.broadcast %33 : vector<16x1xf32> to vector<16x128xf32>
    %36 = vector.broadcast %34 : vector<1x128xf32> to vector<16x128xf32>
    %37 = arith.mulf %35, %36 : vector<16x128xf32>
    %38 = arith.addf %32, %37 : vector<16x128xf32>
    %c0_12 = arith.constant 0 : index
    %c1_13 = arith.constant 1 : index
    %39 = vector.load %arg4[%c0_12, %c1_13] : memref<16x16xf32, #tpu.memory_space<vmem>>, vector<16x1xf32>
    %40 = vector.extract_strided_slice %29 {offsets = [1, 0], sizes = [1, 128], strides = [1, 1]} : vector<16x128xf32> to vector<1x128xf32>
    %41 = vector.broadcast %39 : vector<16x1xf32> to vector<16x128xf32>
    %42 = vector.broadcast %40 : vector<1x128xf32> to vector<16x128xf32>
    %43 = arith.mulf %41, %42 : vector<16x128xf32>
    %44 = arith.addf %38, %43 : vector<16x128xf32>
    %c0_14 = arith.constant 0 : index
    %c2_15 = arith.constant 2 : index
    %45 = vector.load %arg4[%c0_14, %c2_15] : memref<16x16xf32, #tpu.memory_space<vmem>>, vector<16x1xf32>
    %46 = vector.extract_strided_slice %29 {offsets = [2, 0], sizes = [1, 128], strides = [1, 1]} : vector<16x128xf32> to vector<1x128xf32>
    %47 = vector.broadcast %45 : vector<16x1xf32> to vector<16x128xf32>
    %48 = vector.broadcast %46 : vector<1x128xf32> to vector<16x128xf32>
    %49 = arith.mulf %47, %48 : vector<16x128xf32>
    %50 = arith.addf %44, %49 : vector<16x128xf32>
    %c0_16 = arith.constant 0 : index
    %c3_17 = arith.constant 3 : index
    %51 = vector.load %arg4[%c0_16, %c3_17] : memref<16x16xf32, #tpu.memory_space<vmem>>, vector<16x1xf32>
    %52 = vector.extract_strided_slice %29 {offsets = [3, 0], sizes = [1, 128], strides = [1, 1]} : vector<16x128xf32> to vector<1x128xf32>
    %53 = vector.broadcast %51 : vector<16x1xf32> to vector<16x128xf32>
    %54 = vector.broadcast %52 : vector<1x128xf32> to vector<16x128xf32>
    %55 = arith.mulf %53, %54 : vector<16x128xf32>
    %56 = arith.addf %50, %55 : vector<16x128xf32>
    %c0_18 = arith.constant 0 : index
    %c4 = arith.constant 4 : index
    %57 = vector.load %arg4[%c0_18, %c4] : memref<16x16xf32, #tpu.memory_space<vmem>>, vector<16x1xf32>
    %58 = vector.extract_strided_slice %29 {offsets = [4, 0], sizes = [1, 128], strides = [1, 1]} : vector<16x128xf32> to vector<1x128xf32>
    %59 = vector.broadcast %57 : vector<16x1xf32> to vector<16x128xf32>
    %60 = vector.broadcast %58 : vector<1x128xf32> to vector<16x128xf32>
    %61 = arith.mulf %59, %60 : vector<16x128xf32>
    %62 = arith.addf %56, %61 : vector<16x128xf32>
    %c0_19 = arith.constant 0 : index
    %c5 = arith.constant 5 : index
    %63 = vector.load %arg4[%c0_19, %c5] : memref<16x16xf32, #tpu.memory_space<vmem>>, vector<16x1xf32>
    %64 = vector.extract_strided_slice %29 {offsets = [5, 0], sizes = [1, 128], strides = [1, 1]} : vector<16x128xf32> to vector<1x128xf32>
    %65 = vector.broadcast %63 : vector<16x1xf32> to vector<16x128xf32>
    %66 = vector.broadcast %64 : vector<1x128xf32> to vector<16x128xf32>
    %67 = arith.mulf %65, %66 : vector<16x128xf32>
    %68 = arith.addf %62, %67 : vector<16x128xf32>
    %c0_20 = arith.constant 0 : index
    %c6 = arith.constant 6 : index
    %69 = vector.load %arg4[%c0_20, %c6] : memref<16x16xf32, #tpu.memory_space<vmem>>, vector<16x1xf32>
    %70 = vector.extract_strided_slice %29 {offsets = [6, 0], sizes = [1, 128], strides = [1, 1]} : vector<16x128xf32> to vector<1x128xf32>
    %71 = vector.broadcast %69 : vector<16x1xf32> to vector<16x128xf32>
    %72 = vector.broadcast %70 : vector<1x128xf32> to vector<16x128xf32>
    %73 = arith.mulf %71, %72 : vector<16x128xf32>
    %74 = arith.addf %68, %73 : vector<16x128xf32>
    %c0_21 = arith.constant 0 : index
    %c7 = arith.constant 7 : index
    %75 = vector.load %arg4[%c0_21, %c7] : memref<16x16xf32, #tpu.memory_space<vmem>>, vector<16x1xf32>
    %76 = vector.extract_strided_slice %29 {offsets = [7, 0], sizes = [1, 128], strides = [1, 1]} : vector<16x128xf32> to vector<1x128xf32>
    %77 = vector.broadcast %75 : vector<16x1xf32> to vector<16x128xf32>
    %78 = vector.broadcast %76 : vector<1x128xf32> to vector<16x128xf32>
    %79 = arith.mulf %77, %78 : vector<16x128xf32>
    %80 = arith.addf %74, %79 : vector<16x128xf32>
    %c0_22 = arith.constant 0 : index
    %c8 = arith.constant 8 : index
    %81 = vector.load %arg4[%c0_22, %c8] : memref<16x16xf32, #tpu.memory_space<vmem>>, vector<16x1xf32>
    %82 = vector.extract_strided_slice %29 {offsets = [8, 0], sizes = [1, 128], strides = [1, 1]} : vector<16x128xf32> to vector<1x128xf32>
    %83 = vector.broadcast %81 : vector<16x1xf32> to vector<16x128xf32>
    %84 = vector.broadcast %82 : vector<1x128xf32> to vector<16x128xf32>
    %85 = arith.mulf %83, %84 : vector<16x128xf32>
    %86 = arith.addf %80, %85 : vector<16x128xf32>
    %c0_23 = arith.constant 0 : index
    %c9 = arith.constant 9 : index
    %87 = vector.load %arg4[%c0_23, %c9] : memref<16x16xf32, #tpu.memory_space<vmem>>, vector<16x1xf32>
    %88 = vector.extract_strided_slice %29 {offsets = [9, 0], sizes = [1, 128], strides = [1, 1]} : vector<16x128xf32> to vector<1x128xf32>
    %89 = vector.broadcast %87 : vector<16x1xf32> to vector<16x128xf32>
    %90 = vector.broadcast %88 : vector<1x128xf32> to vector<16x128xf32>
    %91 = arith.mulf %89, %90 : vector<16x128xf32>
    %92 = arith.addf %86, %91 : vector<16x128xf32>
    %c0_24 = arith.constant 0 : index
    %c10 = arith.constant 10 : index
    %93 = vector.load %arg4[%c0_24, %c10] : memref<16x16xf32, #tpu.memory_space<vmem>>, vector<16x1xf32>
    %94 = vector.extract_strided_slice %29 {offsets = [10, 0], sizes = [1, 128], strides = [1, 1]} : vector<16x128xf32> to vector<1x128xf32>
    %95 = vector.broadcast %93 : vector<16x1xf32> to vector<16x128xf32>
    %96 = vector.broadcast %94 : vector<1x128xf32> to vector<16x128xf32>
    %97 = arith.mulf %95, %96 : vector<16x128xf32>
    %98 = arith.addf %92, %97 : vector<16x128xf32>
    %c0_25 = arith.constant 0 : index
    %c11 = arith.constant 11 : index
    %99 = vector.load %arg4[%c0_25, %c11] : memref<16x16xf32, #tpu.memory_space<vmem>>, vector<16x1xf32>
    %100 = vector.extract_strided_slice %29 {offsets = [11, 0], sizes = [1, 128], strides = [1, 1]} : vector<16x128xf32> to vector<1x128xf32>
    %101 = vector.broadcast %99 : vector<16x1xf32> to vector<16x128xf32>
    %102 = vector.broadcast %100 : vector<1x128xf32> to vector<16x128xf32>
    %103 = arith.mulf %101, %102 : vector<16x128xf32>
    %104 = arith.addf %98, %103 : vector<16x128xf32>
    %c0_26 = arith.constant 0 : index
    %c12 = arith.constant 12 : index
    %105 = vector.load %arg4[%c0_26, %c12] : memref<16x16xf32, #tpu.memory_space<vmem>>, vector<16x1xf32>
    %106 = vector.extract_strided_slice %29 {offsets = [12, 0], sizes = [1, 128], strides = [1, 1]} : vector<16x128xf32> to vector<1x128xf32>
    %107 = vector.broadcast %105 : vector<16x1xf32> to vector<16x128xf32>
    %108 = vector.broadcast %106 : vector<1x128xf32> to vector<16x128xf32>
    %109 = arith.mulf %107, %108 : vector<16x128xf32>
    %110 = arith.addf %104, %109 : vector<16x128xf32>
    %c0_27 = arith.constant 0 : index
    %c13 = arith.constant 13 : index
    %111 = vector.load %arg4[%c0_27, %c13] : memref<16x16xf32, #tpu.memory_space<vmem>>, vector<16x1xf32>
    %112 = vector.extract_strided_slice %29 {offsets = [13, 0], sizes = [1, 128], strides = [1, 1]} : vector<16x128xf32> to vector<1x128xf32>
    %113 = vector.broadcast %111 : vector<16x1xf32> to vector<16x128xf32>
    %114 = vector.broadcast %112 : vector<1x128xf32> to vector<16x128xf32>
    %115 = arith.mulf %113, %114 : vector<16x128xf32>
    %116 = arith.addf %110, %115 : vector<16x128xf32>
    %c0_28 = arith.constant 0 : index
    %c14 = arith.constant 14 : index
    %117 = vector.load %arg4[%c0_28, %c14] : memref<16x16xf32, #tpu.memory_space<vmem>>, vector<16x1xf32>
    %118 = vector.extract_strided_slice %29 {offsets = [14, 0], sizes = [1, 128], strides = [1, 1]} : vector<16x128xf32> to vector<1x128xf32>
    %119 = vector.broadcast %117 : vector<16x1xf32> to vector<16x128xf32>
    %120 = vector.broadcast %118 : vector<1x128xf32> to vector<16x128xf32>
    %121 = arith.mulf %119, %120 : vector<16x128xf32>
    %122 = arith.addf %116, %121 : vector<16x128xf32>
    %c0_29 = arith.constant 0 : index
    %c15 = arith.constant 15 : index
    %123 = vector.load %arg4[%c0_29, %c15] : memref<16x16xf32, #tpu.memory_space<vmem>>, vector<16x1xf32>
    %124 = vector.extract_strided_slice %29 {offsets = [15, 0], sizes = [1, 128], strides = [1, 1]} : vector<16x128xf32> to vector<1x128xf32>
    %125 = vector.broadcast %123 : vector<16x1xf32> to vector<16x128xf32>
    %126 = vector.broadcast %124 : vector<1x128xf32> to vector<16x128xf32>
    %127 = arith.mulf %125, %126 : vector<16x128xf32>
    %128 = arith.addf %122, %127 : vector<16x128xf32>
    %cst_30 = arith.constant 0.000000e+00 : f32
    %129 = vector.broadcast %cst_30 : f32 to vector<16x128xf32>
    %130 = arith.maximumf %128, %129 : vector<16x128xf32>
    %c0_31 = arith.constant 0 : index
    %c0_32 = arith.constant 0 : index
    %131 = vector.load %arg7[%c0_31, %c0_32] : memref<16x1xf32, #tpu.memory_space<vmem>>, vector<16x1xf32>
    %132 = vector.shape_cast %131 : vector<16x1xf32> to vector<16x1xf32>
    %133 = vector.broadcast %132 : vector<16x1xf32> to vector<16x128xf32>
    %c0_33 = arith.constant 0 : index
    %c0_34 = arith.constant 0 : index
    %134 = vector.load %arg6[%c0_33, %c0_34] : memref<16x16xf32, #tpu.memory_space<vmem>>, vector<16x1xf32>
    %135 = vector.extract_strided_slice %130 {offsets = [0, 0], sizes = [1, 128], strides = [1, 1]} : vector<16x128xf32> to vector<1x128xf32>
    %136 = vector.broadcast %134 : vector<16x1xf32> to vector<16x128xf32>
    %137 = vector.broadcast %135 : vector<1x128xf32> to vector<16x128xf32>
    %138 = arith.mulf %136, %137 : vector<16x128xf32>
    %139 = arith.addf %133, %138 : vector<16x128xf32>
    %c0_35 = arith.constant 0 : index
    %c1_36 = arith.constant 1 : index
    %140 = vector.load %arg6[%c0_35, %c1_36] : memref<16x16xf32, #tpu.memory_space<vmem>>, vector<16x1xf32>
    %141 = vector.extract_strided_slice %130 {offsets = [1, 0], sizes = [1, 128], strides = [1, 1]} : vector<16x128xf32> to vector<1x128xf32>
    %142 = vector.broadcast %140 : vector<16x1xf32> to vector<16x128xf32>
    %143 = vector.broadcast %141 : vector<1x128xf32> to vector<16x128xf32>
    %144 = arith.mulf %142, %143 : vector<16x128xf32>
    %145 = arith.addf %139, %144 : vector<16x128xf32>
    %c0_37 = arith.constant 0 : index
    %c2_38 = arith.constant 2 : index
    %146 = vector.load %arg6[%c0_37, %c2_38] : memref<16x16xf32, #tpu.memory_space<vmem>>, vector<16x1xf32>
    %147 = vector.extract_strided_slice %130 {offsets = [2, 0], sizes = [1, 128], strides = [1, 1]} : vector<16x128xf32> to vector<1x128xf32>
    %148 = vector.broadcast %146 : vector<16x1xf32> to vector<16x128xf32>
    %149 = vector.broadcast %147 : vector<1x128xf32> to vector<16x128xf32>
    %150 = arith.mulf %148, %149 : vector<16x128xf32>
    %151 = arith.addf %145, %150 : vector<16x128xf32>
    %c0_39 = arith.constant 0 : index
    %c3_40 = arith.constant 3 : index
    %152 = vector.load %arg6[%c0_39, %c3_40] : memref<16x16xf32, #tpu.memory_space<vmem>>, vector<16x1xf32>
    %153 = vector.extract_strided_slice %130 {offsets = [3, 0], sizes = [1, 128], strides = [1, 1]} : vector<16x128xf32> to vector<1x128xf32>
    %154 = vector.broadcast %152 : vector<16x1xf32> to vector<16x128xf32>
    %155 = vector.broadcast %153 : vector<1x128xf32> to vector<16x128xf32>
    %156 = arith.mulf %154, %155 : vector<16x128xf32>
    %157 = arith.addf %151, %156 : vector<16x128xf32>
    %c0_41 = arith.constant 0 : index
    %c4_42 = arith.constant 4 : index
    %158 = vector.load %arg6[%c0_41, %c4_42] : memref<16x16xf32, #tpu.memory_space<vmem>>, vector<16x1xf32>
    %159 = vector.extract_strided_slice %130 {offsets = [4, 0], sizes = [1, 128], strides = [1, 1]} : vector<16x128xf32> to vector<1x128xf32>
    %160 = vector.broadcast %158 : vector<16x1xf32> to vector<16x128xf32>
    %161 = vector.broadcast %159 : vector<1x128xf32> to vector<16x128xf32>
    %162 = arith.mulf %160, %161 : vector<16x128xf32>
    %163 = arith.addf %157, %162 : vector<16x128xf32>
    %c0_43 = arith.constant 0 : index
    %c5_44 = arith.constant 5 : index
    %164 = vector.load %arg6[%c0_43, %c5_44] : memref<16x16xf32, #tpu.memory_space<vmem>>, vector<16x1xf32>
    %165 = vector.extract_strided_slice %130 {offsets = [5, 0], sizes = [1, 128], strides = [1, 1]} : vector<16x128xf32> to vector<1x128xf32>
    %166 = vector.broadcast %164 : vector<16x1xf32> to vector<16x128xf32>
    %167 = vector.broadcast %165 : vector<1x128xf32> to vector<16x128xf32>
    %168 = arith.mulf %166, %167 : vector<16x128xf32>
    %169 = arith.addf %163, %168 : vector<16x128xf32>
    %c0_45 = arith.constant 0 : index
    %c6_46 = arith.constant 6 : index
    %170 = vector.load %arg6[%c0_45, %c6_46] : memref<16x16xf32, #tpu.memory_space<vmem>>, vector<16x1xf32>
    %171 = vector.extract_strided_slice %130 {offsets = [6, 0], sizes = [1, 128], strides = [1, 1]} : vector<16x128xf32> to vector<1x128xf32>
    %172 = vector.broadcast %170 : vector<16x1xf32> to vector<16x128xf32>
    %173 = vector.broadcast %171 : vector<1x128xf32> to vector<16x128xf32>
    %174 = arith.mulf %172, %173 : vector<16x128xf32>
    %175 = arith.addf %169, %174 : vector<16x128xf32>
    %c0_47 = arith.constant 0 : index
    %c7_48 = arith.constant 7 : index
    %176 = vector.load %arg6[%c0_47, %c7_48] : memref<16x16xf32, #tpu.memory_space<vmem>>, vector<16x1xf32>
    %177 = vector.extract_strided_slice %130 {offsets = [7, 0], sizes = [1, 128], strides = [1, 1]} : vector<16x128xf32> to vector<1x128xf32>
    %178 = vector.broadcast %176 : vector<16x1xf32> to vector<16x128xf32>
    %179 = vector.broadcast %177 : vector<1x128xf32> to vector<16x128xf32>
    %180 = arith.mulf %178, %179 : vector<16x128xf32>
    %181 = arith.addf %175, %180 : vector<16x128xf32>
    %c0_49 = arith.constant 0 : index
    %c8_50 = arith.constant 8 : index
    %182 = vector.load %arg6[%c0_49, %c8_50] : memref<16x16xf32, #tpu.memory_space<vmem>>, vector<16x1xf32>
    %183 = vector.extract_strided_slice %130 {offsets = [8, 0], sizes = [1, 128], strides = [1, 1]} : vector<16x128xf32> to vector<1x128xf32>
    %184 = vector.broadcast %182 : vector<16x1xf32> to vector<16x128xf32>
    %185 = vector.broadcast %183 : vector<1x128xf32> to vector<16x128xf32>
    %186 = arith.mulf %184, %185 : vector<16x128xf32>
    %187 = arith.addf %181, %186 : vector<16x128xf32>
    %c0_51 = arith.constant 0 : index
    %c9_52 = arith.constant 9 : index
    %188 = vector.load %arg6[%c0_51, %c9_52] : memref<16x16xf32, #tpu.memory_space<vmem>>, vector<16x1xf32>
    %189 = vector.extract_strided_slice %130 {offsets = [9, 0], sizes = [1, 128], strides = [1, 1]} : vector<16x128xf32> to vector<1x128xf32>
    %190 = vector.broadcast %188 : vector<16x1xf32> to vector<16x128xf32>
    %191 = vector.broadcast %189 : vector<1x128xf32> to vector<16x128xf32>
    %192 = arith.mulf %190, %191 : vector<16x128xf32>
    %193 = arith.addf %187, %192 : vector<16x128xf32>
    %c0_53 = arith.constant 0 : index
    %c10_54 = arith.constant 10 : index
    %194 = vector.load %arg6[%c0_53, %c10_54] : memref<16x16xf32, #tpu.memory_space<vmem>>, vector<16x1xf32>
    %195 = vector.extract_strided_slice %130 {offsets = [10, 0], sizes = [1, 128], strides = [1, 1]} : vector<16x128xf32> to vector<1x128xf32>
    %196 = vector.broadcast %194 : vector<16x1xf32> to vector<16x128xf32>
    %197 = vector.broadcast %195 : vector<1x128xf32> to vector<16x128xf32>
    %198 = arith.mulf %196, %197 : vector<16x128xf32>
    %199 = arith.addf %193, %198 : vector<16x128xf32>
    %c0_55 = arith.constant 0 : index
    %c11_56 = arith.constant 11 : index
    %200 = vector.load %arg6[%c0_55, %c11_56] : memref<16x16xf32, #tpu.memory_space<vmem>>, vector<16x1xf32>
    %201 = vector.extract_strided_slice %130 {offsets = [11, 0], sizes = [1, 128], strides = [1, 1]} : vector<16x128xf32> to vector<1x128xf32>
    %202 = vector.broadcast %200 : vector<16x1xf32> to vector<16x128xf32>
    %203 = vector.broadcast %201 : vector<1x128xf32> to vector<16x128xf32>
    %204 = arith.mulf %202, %203 : vector<16x128xf32>
    %205 = arith.addf %199, %204 : vector<16x128xf32>
    %c0_57 = arith.constant 0 : index
    %c12_58 = arith.constant 12 : index
    %206 = vector.load %arg6[%c0_57, %c12_58] : memref<16x16xf32, #tpu.memory_space<vmem>>, vector<16x1xf32>
    %207 = vector.extract_strided_slice %130 {offsets = [12, 0], sizes = [1, 128], strides = [1, 1]} : vector<16x128xf32> to vector<1x128xf32>
    %208 = vector.broadcast %206 : vector<16x1xf32> to vector<16x128xf32>
    %209 = vector.broadcast %207 : vector<1x128xf32> to vector<16x128xf32>
    %210 = arith.mulf %208, %209 : vector<16x128xf32>
    %211 = arith.addf %205, %210 : vector<16x128xf32>
    %c0_59 = arith.constant 0 : index
    %c13_60 = arith.constant 13 : index
    %212 = vector.load %arg6[%c0_59, %c13_60] : memref<16x16xf32, #tpu.memory_space<vmem>>, vector<16x1xf32>
    %213 = vector.extract_strided_slice %130 {offsets = [13, 0], sizes = [1, 128], strides = [1, 1]} : vector<16x128xf32> to vector<1x128xf32>
    %214 = vector.broadcast %212 : vector<16x1xf32> to vector<16x128xf32>
    %215 = vector.broadcast %213 : vector<1x128xf32> to vector<16x128xf32>
    %216 = arith.mulf %214, %215 : vector<16x128xf32>
    %217 = arith.addf %211, %216 : vector<16x128xf32>
    %c0_61 = arith.constant 0 : index
    %c14_62 = arith.constant 14 : index
    %218 = vector.load %arg6[%c0_61, %c14_62] : memref<16x16xf32, #tpu.memory_space<vmem>>, vector<16x1xf32>
    %219 = vector.extract_strided_slice %130 {offsets = [14, 0], sizes = [1, 128], strides = [1, 1]} : vector<16x128xf32> to vector<1x128xf32>
    %220 = vector.broadcast %218 : vector<16x1xf32> to vector<16x128xf32>
    %221 = vector.broadcast %219 : vector<1x128xf32> to vector<16x128xf32>
    %222 = arith.mulf %220, %221 : vector<16x128xf32>
    %223 = arith.addf %217, %222 : vector<16x128xf32>
    %c0_63 = arith.constant 0 : index
    %c15_64 = arith.constant 15 : index
    %224 = vector.load %arg6[%c0_63, %c15_64] : memref<16x16xf32, #tpu.memory_space<vmem>>, vector<16x1xf32>
    %225 = vector.extract_strided_slice %130 {offsets = [15, 0], sizes = [1, 128], strides = [1, 1]} : vector<16x128xf32> to vector<1x128xf32>
    %226 = vector.broadcast %224 : vector<16x1xf32> to vector<16x128xf32>
    %227 = vector.broadcast %225 : vector<1x128xf32> to vector<16x128xf32>
    %228 = arith.mulf %226, %227 : vector<16x128xf32>
    %229 = arith.addf %223, %228 : vector<16x128xf32>
    %cst_65 = arith.constant 0.000000e+00 : f32
    %230 = vector.broadcast %cst_65 : f32 to vector<16x128xf32>
    %231 = arith.maximumf %229, %230 : vector<16x128xf32>
    %c0_66 = arith.constant 0 : index
    %c0_67 = arith.constant 0 : index
    %232 = vector.load %arg9[%c0_66, %c0_67] : memref<2x1xf32, #tpu.memory_space<vmem>>, vector<2x1xf32>
    %233 = vector.shape_cast %232 : vector<2x1xf32> to vector<2x1xf32>
    %234 = vector.broadcast %233 : vector<2x1xf32> to vector<2x128xf32>
    %c0_68 = arith.constant 0 : index
    %c0_69 = arith.constant 0 : index
    %235 = vector.load %arg8[%c0_68, %c0_69] : memref<2x16xf32, #tpu.memory_space<vmem>>, vector<2x1xf32>
    %236 = vector.extract_strided_slice %231 {offsets = [0, 0], sizes = [1, 128], strides = [1, 1]} : vector<16x128xf32> to vector<1x128xf32>
    %237 = vector.broadcast %235 : vector<2x1xf32> to vector<2x128xf32>
    %238 = vector.broadcast %236 : vector<1x128xf32> to vector<2x128xf32>
    %239 = arith.mulf %237, %238 : vector<2x128xf32>
    %240 = arith.addf %234, %239 : vector<2x128xf32>
    %c0_70 = arith.constant 0 : index
    %c1_71 = arith.constant 1 : index
    %241 = vector.load %arg8[%c0_70, %c1_71] : memref<2x16xf32, #tpu.memory_space<vmem>>, vector<2x1xf32>
    %242 = vector.extract_strided_slice %231 {offsets = [1, 0], sizes = [1, 128], strides = [1, 1]} : vector<16x128xf32> to vector<1x128xf32>
    %243 = vector.broadcast %241 : vector<2x1xf32> to vector<2x128xf32>
    %244 = vector.broadcast %242 : vector<1x128xf32> to vector<2x128xf32>
    %245 = arith.mulf %243, %244 : vector<2x128xf32>
    %246 = arith.addf %240, %245 : vector<2x128xf32>
    %c0_72 = arith.constant 0 : index
    %c2_73 = arith.constant 2 : index
    %247 = vector.load %arg8[%c0_72, %c2_73] : memref<2x16xf32, #tpu.memory_space<vmem>>, vector<2x1xf32>
    %248 = vector.extract_strided_slice %231 {offsets = [2, 0], sizes = [1, 128], strides = [1, 1]} : vector<16x128xf32> to vector<1x128xf32>
    %249 = vector.broadcast %247 : vector<2x1xf32> to vector<2x128xf32>
    %250 = vector.broadcast %248 : vector<1x128xf32> to vector<2x128xf32>
    %251 = arith.mulf %249, %250 : vector<2x128xf32>
    %252 = arith.addf %246, %251 : vector<2x128xf32>
    %c0_74 = arith.constant 0 : index
    %c3_75 = arith.constant 3 : index
    %253 = vector.load %arg8[%c0_74, %c3_75] : memref<2x16xf32, #tpu.memory_space<vmem>>, vector<2x1xf32>
    %254 = vector.extract_strided_slice %231 {offsets = [3, 0], sizes = [1, 128], strides = [1, 1]} : vector<16x128xf32> to vector<1x128xf32>
    %255 = vector.broadcast %253 : vector<2x1xf32> to vector<2x128xf32>
    %256 = vector.broadcast %254 : vector<1x128xf32> to vector<2x128xf32>
    %257 = arith.mulf %255, %256 : vector<2x128xf32>
    %258 = arith.addf %252, %257 : vector<2x128xf32>
    %c0_76 = arith.constant 0 : index
    %c4_77 = arith.constant 4 : index
    %259 = vector.load %arg8[%c0_76, %c4_77] : memref<2x16xf32, #tpu.memory_space<vmem>>, vector<2x1xf32>
    %260 = vector.extract_strided_slice %231 {offsets = [4, 0], sizes = [1, 128], strides = [1, 1]} : vector<16x128xf32> to vector<1x128xf32>
    %261 = vector.broadcast %259 : vector<2x1xf32> to vector<2x128xf32>
    %262 = vector.broadcast %260 : vector<1x128xf32> to vector<2x128xf32>
    %263 = arith.mulf %261, %262 : vector<2x128xf32>
    %264 = arith.addf %258, %263 : vector<2x128xf32>
    %c0_78 = arith.constant 0 : index
    %c5_79 = arith.constant 5 : index
    %265 = vector.load %arg8[%c0_78, %c5_79] : memref<2x16xf32, #tpu.memory_space<vmem>>, vector<2x1xf32>
    %266 = vector.extract_strided_slice %231 {offsets = [5, 0], sizes = [1, 128], strides = [1, 1]} : vector<16x128xf32> to vector<1x128xf32>
    %267 = vector.broadcast %265 : vector<2x1xf32> to vector<2x128xf32>
    %268 = vector.broadcast %266 : vector<1x128xf32> to vector<2x128xf32>
    %269 = arith.mulf %267, %268 : vector<2x128xf32>
    %270 = arith.addf %264, %269 : vector<2x128xf32>
    %c0_80 = arith.constant 0 : index
    %c6_81 = arith.constant 6 : index
    %271 = vector.load %arg8[%c0_80, %c6_81] : memref<2x16xf32, #tpu.memory_space<vmem>>, vector<2x1xf32>
    %272 = vector.extract_strided_slice %231 {offsets = [6, 0], sizes = [1, 128], strides = [1, 1]} : vector<16x128xf32> to vector<1x128xf32>
    %273 = vector.broadcast %271 : vector<2x1xf32> to vector<2x128xf32>
    %274 = vector.broadcast %272 : vector<1x128xf32> to vector<2x128xf32>
    %275 = arith.mulf %273, %274 : vector<2x128xf32>
    %276 = arith.addf %270, %275 : vector<2x128xf32>
    %c0_82 = arith.constant 0 : index
    %c7_83 = arith.constant 7 : index
    %277 = vector.load %arg8[%c0_82, %c7_83] : memref<2x16xf32, #tpu.memory_space<vmem>>, vector<2x1xf32>
    %278 = vector.extract_strided_slice %231 {offsets = [7, 0], sizes = [1, 128], strides = [1, 1]} : vector<16x128xf32> to vector<1x128xf32>
    %279 = vector.broadcast %277 : vector<2x1xf32> to vector<2x128xf32>
    %280 = vector.broadcast %278 : vector<1x128xf32> to vector<2x128xf32>
    %281 = arith.mulf %279, %280 : vector<2x128xf32>
    %282 = arith.addf %276, %281 : vector<2x128xf32>
    %c0_84 = arith.constant 0 : index
    %c8_85 = arith.constant 8 : index
    %283 = vector.load %arg8[%c0_84, %c8_85] : memref<2x16xf32, #tpu.memory_space<vmem>>, vector<2x1xf32>
    %284 = vector.extract_strided_slice %231 {offsets = [8, 0], sizes = [1, 128], strides = [1, 1]} : vector<16x128xf32> to vector<1x128xf32>
    %285 = vector.broadcast %283 : vector<2x1xf32> to vector<2x128xf32>
    %286 = vector.broadcast %284 : vector<1x128xf32> to vector<2x128xf32>
    %287 = arith.mulf %285, %286 : vector<2x128xf32>
    %288 = arith.addf %282, %287 : vector<2x128xf32>
    %c0_86 = arith.constant 0 : index
    %c9_87 = arith.constant 9 : index
    %289 = vector.load %arg8[%c0_86, %c9_87] : memref<2x16xf32, #tpu.memory_space<vmem>>, vector<2x1xf32>
    %290 = vector.extract_strided_slice %231 {offsets = [9, 0], sizes = [1, 128], strides = [1, 1]} : vector<16x128xf32> to vector<1x128xf32>
    %291 = vector.broadcast %289 : vector<2x1xf32> to vector<2x128xf32>
    %292 = vector.broadcast %290 : vector<1x128xf32> to vector<2x128xf32>
    %293 = arith.mulf %291, %292 : vector<2x128xf32>
    %294 = arith.addf %288, %293 : vector<2x128xf32>
    %c0_88 = arith.constant 0 : index
    %c10_89 = arith.constant 10 : index
    %295 = vector.load %arg8[%c0_88, %c10_89] : memref<2x16xf32, #tpu.memory_space<vmem>>, vector<2x1xf32>
    %296 = vector.extract_strided_slice %231 {offsets = [10, 0], sizes = [1, 128], strides = [1, 1]} : vector<16x128xf32> to vector<1x128xf32>
    %297 = vector.broadcast %295 : vector<2x1xf32> to vector<2x128xf32>
    %298 = vector.broadcast %296 : vector<1x128xf32> to vector<2x128xf32>
    %299 = arith.mulf %297, %298 : vector<2x128xf32>
    %300 = arith.addf %294, %299 : vector<2x128xf32>
    %c0_90 = arith.constant 0 : index
    %c11_91 = arith.constant 11 : index
    %301 = vector.load %arg8[%c0_90, %c11_91] : memref<2x16xf32, #tpu.memory_space<vmem>>, vector<2x1xf32>
    %302 = vector.extract_strided_slice %231 {offsets = [11, 0], sizes = [1, 128], strides = [1, 1]} : vector<16x128xf32> to vector<1x128xf32>
    %303 = vector.broadcast %301 : vector<2x1xf32> to vector<2x128xf32>
    %304 = vector.broadcast %302 : vector<1x128xf32> to vector<2x128xf32>
    %305 = arith.mulf %303, %304 : vector<2x128xf32>
    %306 = arith.addf %300, %305 : vector<2x128xf32>
    %c0_92 = arith.constant 0 : index
    %c12_93 = arith.constant 12 : index
    %307 = vector.load %arg8[%c0_92, %c12_93] : memref<2x16xf32, #tpu.memory_space<vmem>>, vector<2x1xf32>
    %308 = vector.extract_strided_slice %231 {offsets = [12, 0], sizes = [1, 128], strides = [1, 1]} : vector<16x128xf32> to vector<1x128xf32>
    %309 = vector.broadcast %307 : vector<2x1xf32> to vector<2x128xf32>
    %310 = vector.broadcast %308 : vector<1x128xf32> to vector<2x128xf32>
    %311 = arith.mulf %309, %310 : vector<2x128xf32>
    %312 = arith.addf %306, %311 : vector<2x128xf32>
    %c0_94 = arith.constant 0 : index
    %c13_95 = arith.constant 13 : index
    %313 = vector.load %arg8[%c0_94, %c13_95] : memref<2x16xf32, #tpu.memory_space<vmem>>, vector<2x1xf32>
    %314 = vector.extract_strided_slice %231 {offsets = [13, 0], sizes = [1, 128], strides = [1, 1]} : vector<16x128xf32> to vector<1x128xf32>
    %315 = vector.broadcast %313 : vector<2x1xf32> to vector<2x128xf32>
    %316 = vector.broadcast %314 : vector<1x128xf32> to vector<2x128xf32>
    %317 = arith.mulf %315, %316 : vector<2x128xf32>
    %318 = arith.addf %312, %317 : vector<2x128xf32>
    %c0_96 = arith.constant 0 : index
    %c14_97 = arith.constant 14 : index
    %319 = vector.load %arg8[%c0_96, %c14_97] : memref<2x16xf32, #tpu.memory_space<vmem>>, vector<2x1xf32>
    %320 = vector.extract_strided_slice %231 {offsets = [14, 0], sizes = [1, 128], strides = [1, 1]} : vector<16x128xf32> to vector<1x128xf32>
    %321 = vector.broadcast %319 : vector<2x1xf32> to vector<2x128xf32>
    %322 = vector.broadcast %320 : vector<1x128xf32> to vector<2x128xf32>
    %323 = arith.mulf %321, %322 : vector<2x128xf32>
    %324 = arith.addf %318, %323 : vector<2x128xf32>
    %c0_98 = arith.constant 0 : index
    %c15_99 = arith.constant 15 : index
    %325 = vector.load %arg8[%c0_98, %c15_99] : memref<2x16xf32, #tpu.memory_space<vmem>>, vector<2x1xf32>
    %326 = vector.extract_strided_slice %231 {offsets = [15, 0], sizes = [1, 128], strides = [1, 1]} : vector<16x128xf32> to vector<1x128xf32>
    %327 = vector.broadcast %325 : vector<2x1xf32> to vector<2x128xf32>
    %328 = vector.broadcast %326 : vector<1x128xf32> to vector<2x128xf32>
    %329 = arith.mulf %327, %328 : vector<2x128xf32>
    %330 = arith.addf %324, %329 : vector<2x128xf32>
    %c0_100 = arith.constant 0 : index
    %c0_101 = arith.constant 0 : index
    %331 = vector.load %arg10[%c0_100, %c0_101] : memref<2x128xf32, #tpu.memory_space<vmem>>, vector<2x128xf32>
    tpu.vector_store %arg10[%c0_100, %c0_101], %330 {strides = array<i32>} : memref<2x128xf32, #tpu.memory_space<vmem>>, vector<2x128xf32>,
    return
  }
  func.func @transform_0(%arg0: i32) -> (i32, i32) {
    %c0_i32 = arith.constant 0 : i32
    %c0_i32_0 = arith.constant 0 : i32
    return %c0_i32, %arg0 : i32, i32
  }
  func.func @transform_1(%arg0: i32) -> (i32, i32) {
    %c0_i32 = arith.constant 0 : i32
    %c0_i32_0 = arith.constant 0 : i32
    %c0_i32_1 = arith.constant 0 : i32
    return %c0_i32, %c0_i32_0 : i32, i32
  }
  func.func @transform_2(%arg0: i32) -> (i32, i32) {
    %c0_i32 = arith.constant 0 : i32
    %c0_i32_0 = arith.constant 0 : i32
    %c0_i32_1 = arith.constant 0 : i32
    return %c0_i32, %c0_i32_0 : i32, i32
  }
  func.func @transform_3(%arg0: i32) -> (i32, i32) {
    %c0_i32 = arith.constant 0 : i32
    %c0_i32_0 = arith.constant 0 : i32
    %c0_i32_1 = arith.constant 0 : i32
    return %c0_i32, %c0_i32_0 : i32, i32
  }
  func.func @transform_4(%arg0: i32) -> (i32, i32) {
    %c0_i32 = arith.constant 0 : i32
    %c0_i32_0 = arith.constant 0 : i32
    %c0_i32_1 = arith.constant 0 : i32
    return %c0_i32, %c0_i32_0 : i32, i32
  }
  func.func @transform_5(%arg0: i32) -> (i32, i32) {
    %c0_i32 = arith.constant 0 : i32
    %c0_i32_0 = arith.constant 0 : i32
    %c0_i32_1 = arith.constant 0 : i32
    return %c0_i32, %c0_i32_0 : i32, i32
  }
  func.func @transform_6(%arg0: i32) -> (i32, i32) {
    %c0_i32 = arith.constant 0 : i32
    %c0_i32_0 = arith.constant 0 : i32
    %c0_i32_1 = arith.constant 0 : i32
    return %c0_i32, %c0_i32_0 : i32, i32
  }
  func.func @transform_7(%arg0: i32) -> (i32, i32) {
    %c0_i32 = arith.constant 0 : i32
    %c0_i32_0 = arith.constant 0 : i32
    %c0_i32_1 = arith.constant 0 : i32
    return %c0_i32, %c0_i32_0 : i32, i32
  }
  func.func @transform_8(%arg0: i32) -> (i32, i32) {
    %c0_i32 = arith.constant 0 : i32
    %c0_i32_0 = arith.constant 0 : i32
    %c0_i32_1 = arith.constant 0 : i32
    return %c0_i32, %c0_i32_0 : i32, i32
  }
  func.func @transform_9(%arg0: i32) -> (i32, i32) {
    %c0_i32 = arith.constant 0 : i32
    %c0_i32_0 = arith.constant 0 : i32
    return %c0_i32, %arg0 : i32, i32
  }
}

</mosaic_0001>

<bundles_post_ra>
// kernel: net_forward.1
= control target key start
LH: loop header
LB: loop body
LE: loop exit
PB: predicated region body
PF: predicated region fallthrough
CT: control target
= control target key end

     0   :  { %v922_v0 = vmov 3   ;;  %v923_v1 = vmov 0   ;;  %v924_v5 = vmov 6   ;;  %v925_v6 = vmov 1   ;;  %s1344_s3 = inlined_call_operand.vmem [shape: f32[16,16], index: 3, kind: input, shape index: {}]   ;;  %s1345_s1 = inlined_call_operand.vmem [shape: f32[16,4], index: 1, kind: input, shape index: {}]   ;;  %s1346_s4 = inlined_call_operand.vmem [shape: f32[16,1], index: 4, kind: input, shape index: {}]   ;;  %s1347_s2 = inlined_call_operand.vmem [shape: f32[16,1], index: 2, kind: input, shape index: {}]   ;;  %s1348_s6 = inlined_call_operand.vmem [shape: f32[16,1], index: 6, kind: input, shape index: {}]   ;;  %s1349_s5 = inlined_call_operand.vmem [shape: f32[16,16], index: 5, kind: input, shape index: {}]   ;;  %s1350_s7 = inlined_call_operand.vmem [shape: f32[2,16], index: 7, kind: input, shape index: {}]   ;;  %s1351_s0 = inlined_call_operand.vmem [shape: f32[4,128], index: 0, kind: input, shape index: {}]   ;;  %s1352_s8 = inlined_call_operand.vmem [shape: f32[2,1], index: 8, kind: input, shape index: {}]   ;;  %s1353_s9 = inlined_call_operand.vmem [shape: f32[2,128], index: 9, kind: output, shape index: {}]  }
   0x1   :  { %859 = vset.pattern.permute.xlu0 %v922_v0  ;;  %852 = vset.pattern.permute.xlu1 %v923_v1  ;;  %v993_v2 = vld [vmem:[%s1344_s3] sm:$0xff]  ;;  %v1002_v4 = vld [vmem:[%s1345_s1 + $0x8] sm:$0xff]  ;;  %v926_v7 = vmov 9   ;;  %v927_v8 = vmov 2   ;;  %v928_v9 = vmov 12   ;;  %v1354_v11 = vmov 13  }
   0x2   :  { %v45_v3 = vld [vmem:[%s1345_s1] sm:$0xff]  ;;  %180 = vperm.xlu0 %859, %v993_v2   ;;  %v1017_v10 = vld [vmem:[%s1344_s3 + $0x8] sm:$0xff]  ;;  %v930_v12 = vmov 15   ;;  %v931_v18 = vmov 4   ;;  %v932_v20 = vmov 5   ;;  %v1356_v22 = vmov 7  }
   0x3   :  { %49 = vperm.xlu1 %852, %v45_v3   ;;  %v116_v13 = vld [vmem:[%s1346_s4 + $0x8] sm:$0xff]  ;;  %v33_v14 = vld [vmem:[%s1347_s2] sm:$0xff]  ;;  %v934_v23 = vmov 8   ;;  %v1355_v24 = vmov 10   ;;  %v936_v25 = vmov 11   ;;  %v937_v26 = vmov 14  }
   0x4   :  { %v34_v15 = vld [vmem:[%s1347_s2 + $0x8] sm:$0xff]  ;;  %v115_v16 = vld [vmem:[%s1346_s4] sm:$0xff]  ;;  %v57_v44 = vlaneseq }
   0x5   :  { %v390_v17 = vld [vmem:[%s1348_s6 + $0x8] sm:$0xff]  ;;  %v1058_v19 = vld [vmem:[%s1349_s5] sm:$0xff] }
   0x6   :  { %863 = vset.pattern.permute.xlu0 %v924_v5  ;;  %v1069_v21 = vld [vmem:[%s1349_s5 + $0x8] sm:$0xff]  ;;  %v1117_v29 = vld [vmem:[%s1350_s7] sm:$0x3]  ;;  %v1163_v47 = vshrl.u32 %v57_v44, 7 }
   0x7   :  { %54 = vperm.xlu1 %852, %v1002_v4   ;;  %228 = vperm.xlu0 %863, %v993_v2   ;;  %v389_v32 = vld [vmem:[%s1348_s6] sm:$0xff] }
   0x8   :  { %v1168_v49 = vsub.s32 0, %v1163_v47  ;;  %v32_v52 = vld [vmem:[%s1351_s0] sm:$0xf]  ;;  %v1176_v54 = vsub.s32 1, %v1163_v47  ;;  %v1179_v55 = vsub.s32 2, %v1163_v47  ;;  %v1185_v58 = vsub.s32 3, %v1163_v47 }
   0xa   :  { %v60_v53 = vrot.slane %v32_v52, %v1168_v49  ;;  %v76_v60 = vrot.slane %v32_v52, %v1176_v54  ;;  %v92_v61 = vrot.slane %v32_v52, %v1179_v55 }
   0xb   :  { %853 = vset.pattern.permute.xlu1 %v925_v6  ;;  %867 = vset.pattern.permute.xlu0 %v926_v7 }
   0xc   :  { %70 = vperm.xlu1 %853, %v1002_v4   ;;  %276 = vperm.xlu0 %867, %v993_v2  }
  0x10   :  { %854 = vset.pattern.permute.xlu1 %v927_v8  ;;  %871 = vset.pattern.permute.xlu0 %v928_v9 }
  0x11   :  { %82 = vperm.xlu1 %854, %v45_v3   ;;  %324 = vperm.xlu0 %871, %v993_v2  }
  0x15   :  { %855 = vset.pattern.permute.xlu1 %v922_v0  ;;  %874 = vset.pattern.permute.xlu0 %v1354_v11 }
  0x16   :  { %98 = vperm.xlu1 %855, %v45_v3   ;;  %344 = vperm.xlu0 %874, %v1017_v10  }
  0x1a   :  { %102 = vperm.xlu1 %855, %v1002_v4   ;;  %876 = vset.pattern.permute.xlu0 %v930_v12 }
  0x1b   :  { %372 = vperm.xlu0 %876, %v993_v2  }
  0x1e   :  { %856 = vset.pattern.permute.xlu1 %v923_v1 }
  0x1f   :  { %124 = vperm.xlu1 %856, %v116_v13   ;;  %877 = vset.pattern.permute.xlu0 %v923_v1 }
  0x20   :  { %37 = vperm.xlu0 %877, %v33_v14  }
  0x23   :  { %131 = vperm.xlu1 %856, %v993_v2  }
  0x24   :  { %42 = vperm.xlu0 %877, %v34_v15  }
  0x27   :  { %857 = vset.pattern.permute.xlu1 %v925_v6 }
  0x28   :  { %148 = vperm.xlu1 %857, %v993_v2   ;;  %119 = vperm.xlu0 %877, %v115_v16  }
  0x2c   :  { %858 = vset.pattern.permute.xlu1 %v927_v8  ;;  %136 = vperm.xlu0 %877, %v1017_v10  }
  0x2d   :  { %164 = vperm.xlu1 %858, %v993_v2  }
  0x30   :  { %398 = vperm.xlu0 %877, %v390_v17  }
  0x31   :  { %168 = vperm.xlu1 %858, %v1017_v10  }
  0x34   :  { %880 = vset.pattern.permute.xlu0 %v925_v6 }
  0x35   :  { %860 = vset.pattern.permute.xlu1 %v922_v0  ;;  %66 = vperm.xlu0 %880, %v45_v3  }
  0x36   :  { %184 = vperm.xlu1 %860, %v1017_v10  }
  0x39   :  { %152 = vperm.xlu0 %880, %v1017_v10  }
  0x3a   :  { %861 = vset.pattern.permute.xlu1 %v931_v18 }
  0x3b   :  { %196 = vperm.xlu1 %861, %v993_v2  }
  0x3d   :  { %422 = vperm.xlu0 %880, %v1058_v19  }
  0x3f   :  { %862 = vset.pattern.permute.xlu1 %v932_v20 }
  0x40   :  { %212 = vperm.xlu1 %862, %v993_v2  }
  0x41   :  { %881 = vset.pattern.permute.xlu0 %v927_v8 }
  0x42   :  { %86 = vperm.xlu0 %881, %v1002_v4  }
  0x44   :  { %216 = vperm.xlu1 %862, %v1017_v10  }
  0x46   :  { %442 = vperm.xlu0 %881, %v1069_v21  }
  0x48   :  { %864 = vset.pattern.permute.xlu1 %v924_v5 }
  0x49   :  { %232 = vperm.xlu1 %864, %v1017_v10  }
  0x4a   :  { %884 = vset.pattern.permute.xlu0 %v931_v18 }
  0x4b   :  { %200 = vperm.xlu0 %884, %v1017_v10  }
  0x4d   :  { %865 = vset.pattern.permute.xlu1 %v1356_v22 }
  0x4e   :  { %244 = vperm.xlu1 %865, %v993_v2  }
  0x4f   :  { %470 = vperm.xlu0 %884, %v1058_v19  }
  0x52   :  { %866 = vset.pattern.permute.xlu1 %v934_v23 }
  0x53   :  { %260 = vperm.xlu1 %866, %v993_v2   ;;  %888 = vset.pattern.permute.xlu0 %v932_v20 }
  0x54   :  { %490 = vperm.xlu0 %888, %v1069_v21  }
  0x57   :  { %264 = vperm.xlu1 %866, %v1017_v10  }
  0x58   :  { %889 = vset.pattern.permute.xlu0 %v1356_v22 }
  0x59   :  { %248 = vperm.xlu0 %889, %v1017_v10  }
  0x5b   :  { %868 = vset.pattern.permute.xlu1 %v926_v7 }
  0x5c   :  { %280 = vperm.xlu1 %868, %v1017_v10  }
  0x5d   :  { %518 = vperm.xlu0 %889, %v1058_v19  }
  0x60   :  { %869 = vset.pattern.permute.xlu1 %v1355_v24 }
  0x61   :  { %292 = vperm.xlu1 %869, %v993_v2   ;;  %893 = vset.pattern.permute.xlu0 %v934_v23 }
  0x62   :  { %538 = vperm.xlu0 %893, %v1069_v21  }
  0x65   :  { %870 = vset.pattern.permute.xlu1 %v936_v25 }
  0x66   :  { %308 = vperm.xlu1 %870, %v993_v2   ;;  %894 = vset.pattern.permute.xlu0 %v1355_v24 }
  0x67   :  { %296 = vperm.xlu0 %894, %v1017_v10  }
  0x6a   :  { %312 = vperm.xlu1 %870, %v1017_v10  }
  0x6b   :  { %566 = vperm.xlu0 %894, %v1058_v19  }
  0x6e   :  { %872 = vset.pattern.permute.xlu1 %v928_v9 }
  0x6f   :  { %328 = vperm.xlu1 %872, %v1017_v10   ;;  %570 = vperm.xlu0 %894, %v1069_v21  }
  0x73   :  { %873 = vset.pattern.permute.xlu1 %v1354_v11  ;;  %902 = vset.pattern.permute.xlu0 %v928_v9 }
  0x74   :  { %340 = vperm.xlu1 %873, %v993_v2   ;;  %602 = vperm.xlu0 %902, %v1069_v21  }
  0x78   :  { %875 = vset.pattern.permute.xlu1 %v937_v26  ;;  %903 = vset.pattern.permute.xlu0 %v1354_v11 }
  0x79   :  { %356 = vperm.xlu1 %875, %v993_v2   ;;  %614 = vperm.xlu0 %903, %v1058_v19  }
  0x7d   :  { %360 = vperm.xlu1 %875, %v1017_v10   ;;  %v1111_v28 = vpop.permute.xlu0 %180  ;;  %618 = vperm.xlu0 %903, %v1069_v21  }
  0x7e   :  { %v50_v27 = vpop.permute.xlu1 %49 }
  0x7f   :  { %v61_v59 = vmul.f32 %v60_v53, %v50_v27 }
  0x81   :  { %878 = vset.pattern.permute.xlu1 %v930_v12  ;;  %907 = vset.pattern.permute.xlu0 %v922_v0 }
  0x82   :  { %376 = vperm.xlu1 %878, %v1017_v10   ;;  %v1121_v30 = vpop.permute.xlu1 %54  ;;  %v1124_v31 = vpop.permute.xlu0 %228  ;;  %702 = vperm.xlu0 %907, %v1117_v29  }
  0x86   :  { %879 = vset.pattern.permute.xlu1 %v923_v1  ;;  %910 = vset.pattern.permute.xlu0 %v932_v20 }
  0x87   :  { %393 = vperm.xlu1 %879, %v389_v32   ;;  %v1131_v33 = vpop.permute.xlu1 %70  ;;  %v1134_v34 = vpop.permute.xlu0 %276  ;;  %722 = vperm.xlu0 %910, %v1117_v29   ;;  %v62_v32 = vmul.f32 %v60_v53, %v1121_v30  ;;  %v1208_v53 = vsub.s32 5, %v1163_v47 }
  0x8b   :  { %405 = vperm.xlu1 %879, %v1058_v19   ;;  %913 = vset.pattern.permute.xlu0 %v934_v23 }
  0x8c   :  { %v83_v35 = vpop.permute.xlu1 %82  ;;  %v1139_v36 = vpop.permute.xlu0 %324  ;;  %752 = vperm.xlu0 %913, %v1117_v29  }
  0x8d   :  { %v93_v4 = vmul.f32 %v92_v61, %v83_v35 }
  0x8f   :  { %410 = vperm.xlu1 %879, %v1069_v21  }
  0x90   :  { %916 = vset.pattern.permute.xlu0 %v936_v25 }
  0x91   :  { %v99_v37 = vpop.permute.xlu1 %98  ;;  %v1144_v38 = vpop.permute.xlu0 %344  ;;  %782 = vperm.xlu0 %916, %v1117_v29  }
  0x93   :  { %882 = vset.pattern.permute.xlu1 %v925_v6 }
  0x94   :  { %426 = vperm.xlu1 %882, %v1069_v21  }
  0x95   :  { %v1149_v39 = vpop.permute.xlu1 %102  ;;  %919 = vset.pattern.permute.xlu0 %v937_v26 }
  0x96   :  { %v1152_v40 = vpop.permute.xlu0 %372  ;;  %812 = vperm.xlu0 %919, %v1117_v29  }
  0x98   :  { %883 = vset.pattern.permute.xlu1 %v927_v8 }
  0x99   :  { %438 = vperm.xlu1 %883, %v1058_v19  }
  0x9a   :  { %v1157_v41 = vpop.permute.xlu1 %124  ;;  %921 = vset.pattern.permute.xlu0 %v930_v12 }
  0x9b   :  { %v38_v42 = vpop.permute.xlu0 %37 }
  0x9c   :  { %v63_v2 = vadd.f32 %v61_v59, %v38_v42 }
  0x9d   :  { %885 = vset.pattern.permute.xlu1 %v922_v0  ;;  %v108_v0 = vrot.slane %v32_v52, %v1185_v58 }
  0x9e   :  { %454 = vperm.xlu1 %885, %v1058_v19   ;;  %v132_v43 = vpop.permute.xlu1 %131 }
  0x9f   :  { %v43_v45 = vpop.permute.xlu0 %42  ;;  %v109_v14 = vmul.f32 %v108_v0, %v99_v37  ;;  %v1201_v37 = vsub.s32 4, %v1163_v47 }
  0xa0   :  { %v64_v52 = vadd.f32 %v62_v32, %v43_v45 }
  0xa2   :  { %458 = vperm.xlu1 %885, %v1069_v21  }
  0xa3   :  { %v149_v46 = vpop.permute.xlu1 %148  ;;  %v120_v48 = vpop.permute.xlu0 %119 }
  0xa6   :  { %886 = vset.pattern.permute.xlu1 %v931_v18 }
  0xa7   :  { %474 = vperm.xlu1 %886, %v1069_v21   ;;  %v137_v51 = vpop.permute.xlu0 %136 }
  0xa8   :  { %v165_v50 = vpop.permute.xlu1 %164 }
  0xab   :  { %887 = vset.pattern.permute.xlu1 %v932_v20  ;;  %v1182_v57 = vpop.permute.xlu0 %398 }
  0xac   :  { %486 = vperm.xlu1 %887, %v1058_v19   ;;  %v169_v56 = vpop.permute.xlu1 %168 }
  0xb0   :  { %890 = vset.pattern.permute.xlu1 %v924_v5  ;;  %v67_v62 = vpop.permute.xlu0 %66 }
  0xb1   :  { %502 = vperm.xlu1 %890, %v1058_v19   ;;  %v185_v63 = vpop.permute.xlu1 %184  ;;  %v77_v3 = vmul.f32 %v76_v60, %v67_v62 }
  0xb3   :  { %v79_v10 = vadd.f32 %v77_v3, %v63_v2 }
  0xb4   :  { %v153_v13 = vpop.permute.xlu0 %152 }
  0xb5   :  { %506 = vperm.xlu1 %890, %v1069_v21   ;;  %v95_v15 = vadd.f32 %v93_v4, %v79_v10  ;;  %v78_v4 = vmul.f32 %v76_v60, %v1131_v33 }
  0xb6   :  { %v197_v16 = vpop.permute.xlu1 %196 }
  0xb7   :  { %v111_v17 = vadd.f32 %v109_v14, %v95_v15  ;;  %v80_v15 = vadd.f32 %v78_v4, %v64_v52 }
  0xb8   :  { %v1194_v20 = vpop.permute.xlu0 %422 }
  0xb9   :  { %891 = vset.pattern.permute.xlu1 %v1356_v22  ;;  %v113_v27 = vmax.f32 %v111_v17, 0.0  ;;  %v110_v22 = vmul.f32 %v108_v0, %v1149_v39 }
  0xba   :  { %522 = vperm.xlu1 %891, %v1069_v21  }
  0xbb   :  { %v213_v42 = vpop.permute.xlu1 %212  ;;  %v142_v35 = vrot.slane %v113_v27, %v1168_v49  ;;  %v158_v44 = vrot.slane %v113_v27, %v1176_v54  ;;  %v174_v2 = vrot.slane %v113_v27, %v1179_v55  ;;  %v190_v30 = vrot.slane %v113_v27, %v1185_v58 }
  0xbc   :  { %v206_v17 = vrot.slane %v113_v27, %v1201_v37 }
  0xbd   :  { %v143_v59 = vmul.f32 %v142_v35, %v132_v43  ;;  %v144_v62 = vmul.f32 %v142_v35, %v137_v51  ;;  %v87_v3 = vpop.permute.xlu0 %86  ;;  %v159_v43 = vmul.f32 %v158_v44, %v149_v46  ;;  %v160_v51 = vmul.f32 %v158_v44, %v153_v13 }
  0xbe   :  { %892 = vset.pattern.permute.xlu1 %v934_v23  ;;  %v94_v32 = vmul.f32 %v92_v61, %v87_v3  ;;  %v1214_v23 = vsub.s32 6, %v1163_v47  ;;  %v176_v35 = vmul.f32 %v174_v2, %v169_v56  ;;  %v175_v11 = vmul.f32 %v174_v2, %v165_v50 }
  0xbf   :  { %534 = vperm.xlu1 %892, %v1058_v19   ;;  %v217_v45 = vpop.permute.xlu1 %216  ;;  %v145_v10 = vadd.f32 %v143_v59, %v120_v48  ;;  %v146_v14 = vadd.f32 %v144_v62, %v1157_v41  ;;  %v191_v41 = vmul.f32 %v190_v30, %v1111_v28  ;;  %v222_v61 = vrot.slane %v113_v27, %v1208_v53 }
  0xc0   :  { %v96_v48 = vadd.f32 %v94_v32, %v80_v15  ;;  %v1224_v56 = vsub.s32 7, %v1163_v47  ;;  %v192_v50 = vmul.f32 %v190_v30, %v185_v63  ;;  %v207_v62 = vmul.f32 %v206_v17, %v197_v16 }
  0xc1   :  { %v161_v33 = vadd.f32 %v159_v43, %v145_v10  ;;  %v162_v60 = vadd.f32 %v160_v51, %v146_v14  ;;  %v1216_v24 = vpop.permute.xlu0 %442  ;;  %v238_v39 = vrot.slane %v113_v27, %v1214_v23  ;;  %v223_v3 = vmul.f32 %v222_v61, %v213_v42 }
  0xc2   :  { %v112_v52 = vadd.f32 %v110_v22, %v96_v48  ;;  %v254_v22 = vrot.slane %v113_v27, %v1224_v56  ;;  %v224_v47 = vmul.f32 %v222_v61, %v217_v45 }
  0xc3   :  { %895 = vset.pattern.permute.xlu1 %v926_v7  ;;  %v178_v46 = vadd.f32 %v176_v35, %v162_v60  ;;  %v177_v13 = vadd.f32 %v175_v11, %v161_v33  ;;  %v239_v63 = vmul.f32 %v238_v39, %v1124_v31 }
  0xc4   :  { %550 = vperm.xlu1 %895, %v1058_v19   ;;  %v233_v44 = vpop.permute.xlu1 %232  ;;  %v1228_v11 = vmax.f32 %v112_v52, 0.0 }
  0xc5   :  { %v193_v59 = vadd.f32 %v191_v41, %v177_v13  ;;  %v194_v28 = vadd.f32 %v192_v50, %v178_v46  ;;  %v240_v43 = vmul.f32 %v238_v39, %v233_v44 }
  0xc6   :  { %v201_v0 = vpop.permute.xlu0 %200  ;;  %v286_v27 = vrot.slane %v1228_v11, %v1176_v54 }
  0xc7   :  { %v209_v2 = vadd.f32 %v207_v62, %v193_v59  ;;  %v208_v4 = vmul.f32 %v206_v17, %v201_v0  ;;  %v270_v17 = vrot.slane %v1228_v11, %v1168_v49 }
  0xc8   :  { %554 = vperm.xlu1 %895, %v1069_v21   ;;  %v287_v48 = vmul.f32 %v286_v27, %v1134_v34  ;;  %v302_v34 = vrot.slane %v1228_v11, %v1179_v55 }
  0xc9   :  { %v245_v10 = vpop.permute.xlu1 %244  ;;  %v225_v14 = vadd.f32 %v223_v3, %v209_v2  ;;  %v210_v30 = vadd.f32 %v208_v4, %v194_v28 }
  0xca   :  { %v1232_v16 = vpop.permute.xlu0 %470  ;;  %v255_v42 = vmul.f32 %v254_v22, %v245_v10  ;;  %v318_v10 = vrot.slane %v1228_v11, %v1185_v58 }
  0xcb   :  { %v226_v51 = vadd.f32 %v224_v47, %v210_v30  ;;  %v241_v15 = vadd.f32 %v239_v63, %v225_v14 }
  0xcc   :  { %896 = vset.pattern.permute.xlu1 %v936_v25 }
  0xcd   :  { %582 = vperm.xlu1 %896, %v1058_v19   ;;  %v257_v45 = vadd.f32 %v255_v42, %v241_v15  ;;  %v242_v31 = vadd.f32 %v240_v43, %v226_v51 }
  0xce   :  { %v261_v32 = vpop.permute.xlu1 %260 }
  0xcf   :  { %v271_v33 = vmul.f32 %v270_v17, %v261_v32  ;;  %v1240_v60 = vpop.permute.xlu0 %490 }
  0xd1   :  { %v273_v35 = vadd.f32 %v271_v33, %v257_v45  ;;  %897 = vset.pattern.permute.xlu1 %v928_v9  ;;  %v350_v45 = vrot.slane %v1228_v11, %v1208_v53 }
  0xd2   :  { %598 = vperm.xlu1 %897, %v1058_v19   ;;  %v265_v41 = vpop.permute.xlu1 %264 }
  0xd3   :  { %v289_v46 = vadd.f32 %v287_v48, %v273_v35  ;;  %v272_v52 = vmul.f32 %v270_v17, %v265_v41  ;;  %v663_v17 = vld [vmem:[%s1352_s8] sm:$0x3] }
  0xd4   :  { %v249_v13 = vpop.permute.xlu0 %248 }
  0xd5   :  { %v256_v61 = vmul.f32 %v254_v22, %v249_v13  ;;  %v334_v22 = vrot.slane %v1228_v11, %v1201_v37  ;;  %v382_v13 = vrot.slane %v1228_v11, %v1224_v56 }
  0xd6   :  { %898 = vset.pattern.permute.xlu1 %v937_v26 }
  0xd7   :  { %630 = vperm.xlu1 %898, %v1058_v19   ;;  %v281_v44 = vpop.permute.xlu1 %280  ;;  %v258_v50 = vadd.f32 %v256_v61, %v242_v31  ;;  %v335_v43 = vmul.f32 %v334_v22, %v1139_v36 }
  0xd8   :  { %v1247_v59 = vpop.permute.xlu0 %518  ;;  %v288_v39 = vmul.f32 %v286_v27, %v281_v44 }
  0xd9   :  { %v274_v62 = vadd.f32 %v272_v52, %v258_v50 }
  0xdb   :  { %899 = vset.pattern.permute.xlu1 %v930_v12  ;;  %v290_v0 = vadd.f32 %v288_v39, %v274_v62 }
  0xdc   :  { %646 = vperm.xlu1 %899, %v1058_v19   ;;  %v293_v2 = vpop.permute.xlu1 %292 }
  0xdd   :  { %v303_v3 = vmul.f32 %v302_v34, %v293_v2  ;;  %v1253_v28 = vpop.permute.xlu0 %538 }
  0xdf   :  { %v305_v4 = vadd.f32 %v303_v3, %v289_v46  ;;  %v366_v46 = vrot.slane %v1228_v11, %v1214_v23 }
  0xe0   :  { %900 = vset.pattern.permute.xlu1 %v936_v25 }
  0xe1   :  { %586 = vperm.xlu1 %900, %v1069_v21   ;;  %v309_v14 = vpop.permute.xlu1 %308 }
  0xe2   :  { %v319_v47 = vmul.f32 %v318_v10, %v309_v14  ;;  %v297_v63 = vpop.permute.xlu0 %296 }
  0xe3   :  { %v304_v19 = vmul.f32 %v302_v34, %v297_v63 }
  0xe4   :  { %v321_v30 = vadd.f32 %v319_v47, %v305_v4 }
  0xe5   :  { %901 = vset.pattern.permute.xlu1 %v923_v1  ;;  %v313_v51 = vpop.permute.xlu1 %312  ;;  %v306_v15 = vadd.f32 %v304_v19, %v290_v0  ;;  %v352_v1 = vmul.f32 %v350_v45, %v1144_v38 }
  0xe6   :  { %v320_v25 = vmul.f32 %v318_v10, %v313_v51  ;;  %672 = vperm.xlu1 %901, %v1117_v29   ;;  %v337_v42 = vadd.f32 %v335_v43, %v321_v30 }
  0xe8   :  { %v322_v27 = vadd.f32 %v320_v25, %v306_v15 }
  0xea   :  { %666 = vperm.xlu1 %901, %v663_v17   ;;  %v329_v32 = vpop.permute.xlu1 %328 }
  0xeb   :  { %v336_v31 = vmul.f32 %v334_v22, %v329_v32 }
  0xed   :  { %v338_v36 = vadd.f32 %v336_v31, %v322_v27 }
  0xee   :  { %904 = vset.pattern.permute.xlu1 %v925_v6  ;;  %v383_v6 = vmul.f32 %v382_v13, %v1152_v40 }
  0xef   :  { %682 = vperm.xlu1 %904, %v1117_v29   ;;  %v341_v33 = vpop.permute.xlu1 %340  ;;  %v354_v35 = vadd.f32 %v352_v1, %v338_v36 }
  0xf0   :  { %v351_v48 = vmul.f32 %v350_v45, %v341_v33 }
  0xf2   :  { %v353_v41 = vadd.f32 %v351_v48, %v337_v42  ;;  %v1358_v42 = vmov 10  }
  0xf3   :  { %905 = vset.pattern.permute.xlu1 %v927_v8 }
  0xf4   :  { %692 = vperm.xlu1 %905, %v1117_v29   ;;  %v357_v61 = vpop.permute.xlu1 %356 }
  0xf5   :  { %v367_v38 = vmul.f32 %v366_v46, %v357_v61 }
  0xf7   :  { %v369_v44 = vadd.f32 %v367_v38, %v353_v41 }
  0xf8   :  { %906 = vset.pattern.permute.xlu1 %v937_v26  ;;  %v361_v52 = vpop.permute.xlu1 %360 }
  0xf9   :  { %v368_v50 = vmul.f32 %v366_v46, %v361_v52  ;;  %634 = vperm.xlu1 %906, %v1069_v21   ;;  %v385_v8 = vadd.f32 %v383_v6, %v369_v44 }
  0xfb   :  { %v370_v62 = vadd.f32 %v368_v50, %v354_v35  ;;  %v387_v0 = vmax.f32 %v385_v8, 0.0  ;;  %v1359_v35 = vmov 13  }
  0xfd   :  { %908 = vset.pattern.permute.xlu1 %v930_v12  ;;  %v377_v39 = vpop.permute.xlu1 %376  ;;  %v416_v26 = vrot.slane %v387_v0, %v1168_v49  ;;  %v432_v2 = vrot.slane %v387_v0, %v1176_v54  ;;  %v448_v63 = vrot.slane %v387_v0, %v1179_v55  ;;  %v464_v27 = vrot.slane %v387_v0, %v1185_v58 }
  0xfe   :  { %v384_v34 = vmul.f32 %v382_v13, %v377_v39  ;;  %650 = vperm.xlu1 %908, %v1069_v21   ;;  %v496_v48 = vrot.slane %v387_v0, %v1208_v53  ;;  %v512_v6 = vrot.slane %v387_v0, %v1214_v23  ;;  %v528_v52 = vrot.slane %v387_v0, %v1224_v56 }
  0xff   :  { %v433_v21 = vmul.f32 %v432_v2, %v1194_v20  ;;  %v450_v20 = vmul.f32 %v448_v63, %v1216_v24 }
 0x100   :  { %v1283_v11 = vadd.f32 %v384_v34, %v370_v62  ;;  %v529_v39 = vmul.f32 %v528_v52, %v1247_v59 }
 0x102   :  { %909 = vset.pattern.permute.xlu1 %v931_v18  ;;  %v394_v40 = vpop.permute.xlu1 %393  ;;  %v1357_v18 = vmov 7   ;;  %v388_v34 = vmax.f32 %v1283_v11, 0.0 }
 0x103   :  { %712 = vperm.xlu1 %909, %v1117_v29  }
 0x104   :  { %v560_v59 = vrot.slane %v388_v34, %v1176_v54  ;;  %v576_v11 = vrot.slane %v388_v34, %v1179_v55 }
 0x106   :  { %v406_v3 = vpop.permute.xlu1 %405 }
 0x107   :  { %v417_v4 = vmul.f32 %v416_v26, %v406_v3  ;;  %911 = vset.pattern.permute.xlu1 %v924_v5 }
 0x108   :  { %732 = vperm.xlu1 %911, %v1117_v29  }
 0x109   :  { %v419_v10 = vadd.f32 %v417_v4, %v394_v40 }
 0x10a   :  { %v411_v22 = vpop.permute.xlu1 %410 }
 0x10b   :  { %v418_v14 = vmul.f32 %v416_v26, %v411_v22  ;;  %v435_v47 = vadd.f32 %v433_v21, %v419_v10 }
 0x10c   :  { %912 = vset.pattern.permute.xlu1 %v1357_v18 }
 0x10d   :  { %742 = vperm.xlu1 %912, %v1117_v29   ;;  %v420_v19 = vadd.f32 %v418_v14, %v1182_v57  ;;  %v480_v57 = vrot.slane %v387_v0, %v1201_v37  ;;  %v567_v14 = vpop.permute.xlu0 %566 }
 0x10f   :  { %v427_v30 = vpop.permute.xlu1 %426  ;;  %v481_v24 = vmul.f32 %v480_v57, %v1232_v16 }
 0x110   :  { %v434_v43 = vmul.f32 %v432_v2, %v427_v30 }
 0x111   :  { %914 = vset.pattern.permute.xlu1 %v926_v7 }
 0x112   :  { %v436_v5 = vadd.f32 %v434_v43, %v420_v19  ;;  %762 = vperm.xlu1 %914, %v1117_v29   ;;  %v577_v19 = vmul.f32 %v576_v11, %v567_v14  ;;  %v571_v43 = vpop.permute.xlu0 %570 }
 0x114   :  { %v439_v51 = vpop.permute.xlu1 %438  ;;  %v452_v15 = vadd.f32 %v450_v20, %v436_v5 }
 0x115   :  { %v449_v25 = vmul.f32 %v448_v63, %v439_v51 }
 0x116   :  { %915 = vset.pattern.permute.xlu1 %v1358_v42 }
 0x117   :  { %v451_v17 = vadd.f32 %v449_v25, %v435_v47  ;;  %772 = vperm.xlu1 %915, %v1117_v29   ;;  %v578_v25 = vmul.f32 %v576_v11, %v571_v43 }
 0x119   :  { %v455_v45 = vpop.permute.xlu1 %454 }
 0x11a   :  { %v465_v32 = vmul.f32 %v464_v27, %v455_v45 }
 0x11b   :  { %917 = vset.pattern.permute.xlu1 %v928_v9  ;;  %v498_v9 = vmul.f32 %v496_v48, %v1240_v60 }
 0x11c   :  { %v467_v7 = vadd.f32 %v465_v32, %v451_v17  ;;  %792 = vperm.xlu1 %917, %v1117_v29   ;;  %v624_v32 = vrot.slane %v388_v34, %v1208_v53 }
 0x11d   :  { %v459_v31 = vpop.permute.xlu1 %458 }
 0x11e   :  { %v466_v36 = vmul.f32 %v464_v27, %v459_v31  ;;  %v483_v1 = vadd.f32 %v481_v24, %v467_v7  ;;  %v603_v27 = vpop.permute.xlu0 %602  ;;  %v608_v7 = vrot.slane %v388_v34, %v1201_v37 }
 0x120   :  { %v468_v33 = vadd.f32 %v466_v36, %v452_v15  ;;  %918 = vset.pattern.permute.xlu1 %v1359_v35  ;;  %v640_v35 = vrot.slane %v388_v34, %v1214_v23 }
 0x121   :  { %802 = vperm.xlu1 %918, %v1117_v29  }
 0x122   :  { %v475_v41 = vpop.permute.xlu1 %474  ;;  %v615_v36 = vpop.permute.xlu0 %614 }
 0x123   :  { %v482_v46 = vmul.f32 %v480_v57, %v475_v41 }
 0x125   :  { %v484_v13 = vadd.f32 %v482_v46, %v468_v33  ;;  %920 = vset.pattern.permute.xlu1 %v930_v12 }
 0x126   :  { %822 = vperm.xlu1 %920, %v1117_v29   ;;  %v544_v29 = vrot.slane %v388_v34, %v1168_v49 }
 0x127   :  { %v487_v16 = vpop.permute.xlu1 %486  ;;  %v500_v61 = vadd.f32 %v498_v9, %v484_v13  ;;  %v656_v9 = vrot.slane %v388_v34, %v1224_v56 }
 0x128   :  { %v497_v38 = vmul.f32 %v496_v48, %v487_v16  ;;  %v546_v10 = vmul.f32 %v544_v29, %v1253_v28  ;;  %v592_v28 = vrot.slane %v388_v34, %v1185_v58 }
 0x12a   :  { %v499_v44 = vadd.f32 %v497_v38, %v483_v1  ;;  %v625_v1 = vmul.f32 %v624_v32, %v615_v36 }
 0x12c   :  { %v503_v50 = vpop.permute.xlu1 %502 }
 0x12d   :  { %v513_v8 = vmul.f32 %v512_v6, %v503_v50  ;;  %v610_v50 = vmul.f32 %v608_v7, %v603_v27 }
 0x12f   :  { %v515_v62 = vadd.f32 %v513_v8, %v499_v44 }
 0x130   :  { %v507_v12 = vpop.permute.xlu1 %506 }
 0x131   :  { %v514_v40 = vmul.f32 %v512_v6, %v507_v12  ;;  %v531_v60 = vadd.f32 %v529_v39, %v515_v62 }
 0x133   :  { %v516_v26 = vadd.f32 %v514_v40, %v500_v61 }
 0x135   :  { %v523_v2 = vpop.permute.xlu1 %522 }
 0x136   :  { %v530_v3 = vmul.f32 %v528_v52, %v523_v2  ;;  %v619_v52 = vpop.permute.xlu0 %618 }
 0x137   :  { %v626_v62 = vmul.f32 %v624_v32, %v619_v52 }
 0x138   :  { %v532_v4 = vadd.f32 %v530_v3, %v516_v26 }
 0x13a   :  { %v535_v21 = vpop.permute.xlu1 %534  ;;  %v548_v0 = vadd.f32 %v546_v10, %v532_v4 }
 0x13b   :  { %v545_v22 = vmul.f32 %v544_v29, %v535_v21 }
 0x13d   :  { %v547_v47 = vadd.f32 %v545_v22, %v531_v60 }
 0x13f   :  { %v551_v18 = vpop.permute.xlu1 %550 }
 0x140   :  { %v561_v63 = vmul.f32 %v560_v59, %v551_v18 }
 0x142   :  { %v563_v30 = vadd.f32 %v561_v63, %v547_v47 }
 0x143   :  { %v555_v5 = vpop.permute.xlu1 %554 }
 0x144   :  { %v562_v20 = vmul.f32 %v560_v59, %v555_v5  ;;  %v579_v51 = vadd.f32 %v577_v19, %v563_v30  ;;  %v703_v30 = vpop.permute.xlu0 %702 }
 0x146   :  { %v564_v15 = vadd.f32 %v562_v20, %v548_v0 }
 0x148   :  { %v583_v42 = vpop.permute.xlu1 %582  ;;  %v580_v17 = vadd.f32 %v578_v25, %v564_v15 }
 0x149   :  { %v593_v57 = vmul.f32 %v592_v28, %v583_v42 }
 0x14b   :  { %v595_v45 = vadd.f32 %v593_v57, %v579_v51 }
 0x14d   :  { %v599_v24 = vpop.permute.xlu1 %598 }
 0x14e   :  { %v609_v31 = vmul.f32 %v608_v7, %v599_v24 }
 0x150   :  { %v611_v33 = vadd.f32 %v609_v31, %v595_v45 }
 0x152   :  { %v631_v48 = vpop.permute.xlu1 %630  ;;  %v627_v41 = vadd.f32 %v625_v1, %v611_v33 }
 0x153   :  { %v641_v46 = vmul.f32 %v640_v35, %v631_v48 }
 0x155   :  { %v643_v13 = vadd.f32 %v641_v46, %v627_v41 }
 0x157   :  { %v647_v16 = vpop.permute.xlu1 %646 }
 0x158   :  { %v657_v61 = vmul.f32 %v656_v9, %v647_v16 }
 0x15a   :  { %v659_v38 = vadd.f32 %v657_v61, %v643_v13 }
 0x15c   :  { %v587_v44 = vpop.permute.xlu1 %586  ;;  %v661_v29 = vmax.f32 %v659_v38, 0.0 }
 0x15d   :  { %v594_v6 = vmul.f32 %v592_v28, %v587_v44 }
 0x15e   :  { %v678_v3 = vrot.slane %v661_v29, %v1168_v49  ;;  %v688_v34 = vrot.slane %v661_v29, %v1176_v54  ;;  %v698_v0 = vrot.slane %v661_v29, %v1179_v55  ;;  %v708_v11 = vrot.slane %v661_v29, %v1185_v58 }
 0x15f   :  { %v596_v8 = vadd.f32 %v594_v6, %v580_v17  ;;  %v718_v51 = vrot.slane %v661_v29, %v1201_v37  ;;  %v728_v25 = vrot.slane %v661_v29, %v1208_v53  ;;  %v723_v17 = vpop.permute.xlu0 %722  ;;  %v738_v7 = vrot.slane %v661_v29, %v1214_v23 }
 0x160   :  { %v709_v20 = vmul.f32 %v708_v11, %v703_v30  ;;  %v748_v36 = vrot.slane %v661_v29, %v1224_v56 }
 0x161   :  { %v612_v39 = vadd.f32 %v610_v50, %v596_v8  ;;  %v673_v12 = vpop.permute.xlu1 %672  ;;  %v729_v57 = vmul.f32 %v728_v25, %v723_v17 }
 0x162   :  { %v679_v10 = vmul.f32 %v678_v3, %v673_v12 }
 0x163   :  { %v628_v40 = vadd.f32 %v626_v62, %v612_v39  ;;  %v753_v41 = vpop.permute.xlu0 %752 }
 0x165   :  { %v667_v60 = vpop.permute.xlu1 %666 }
 0x166   :  { %v680_v14 = vadd.f32 %v679_v10, %v667_v60 }
 0x167   :  { %v783_v62 = vpop.permute.xlu0 %782 }
 0x16a   :  { %v683_v26 = vpop.permute.xlu1 %682 }
 0x16b   :  { %v689_v21 = vmul.f32 %v688_v34, %v683_v26  ;;  %v813_v3 = vpop.permute.xlu0 %812 }
 0x16d   :  { %v690_v18 = vadd.f32 %v689_v21, %v680_v14 }
 0x16f   :  { %v693_v2 = vpop.permute.xlu1 %692 }
 0x170   :  { %v699_v47 = vmul.f32 %v698_v0, %v693_v2 }
 0x172   :  { %v700_v43 = vadd.f32 %v699_v47, %v690_v18 }
 0x174   :  { %v635_v4 = vpop.permute.xlu1 %634  ;;  %v710_v28 = vadd.f32 %v709_v20, %v700_v43 }
 0x175   :  { %v642_v22 = vmul.f32 %v640_v35, %v635_v4 }
 0x177   :  { %v644_v59 = vadd.f32 %v642_v22, %v628_v40 }
 0x179   :  { %v651_v63 = vpop.permute.xlu1 %650 }
 0x17a   :  { %v658_v19 = vmul.f32 %v656_v9, %v651_v63 }
 0x17c   :  { %v660_v5 = vadd.f32 %v658_v19, %v644_v59 }
 0x17e   :  { %v713_v15 = vpop.permute.xlu1 %712  ;;  %v662_v45 = vmax.f32 %v660_v5, 0.0 }
 0x17f   :  { %v719_v42 = vmul.f32 %v718_v51, %v713_v15 }
 0x180   :  { %v758_v1 = vrot.slane %v662_v45, %v1168_v49  ;;  %v768_v9 = vrot.slane %v662_v45, %v1176_v54  ;;  %v788_v6 = vrot.slane %v662_v45, %v1185_v58  ;;  %v778_v52 = vrot.slane %v662_v45, %v1179_v55 }
 0x181   :  { %v720_v27 = vadd.f32 %v719_v42, %v710_v28  ;;  %v798_v12 = vrot.slane %v662_v45, %v1201_v37  ;;  %v818_v54 = vrot.slane %v662_v45, %v1214_v23  ;;  %v808_v2 = vrot.slane %v662_v45, %v1208_v53 }
 0x182   :  { %v759_v13 = vmul.f32 %v758_v1, %v753_v41  ;;  %v789_v49 = vmul.f32 %v788_v6, %v783_v62  ;;  %v828_v10 = vrot.slane %v662_v45, %v1224_v56 }
 0x183   :  { %v733_v32 = vpop.permute.xlu1 %732  ;;  %v730_v24 = vadd.f32 %v729_v57, %v720_v27  ;;  %v819_v4 = vmul.f32 %v818_v54, %v813_v3 }
 0x184   :  { %v739_v31 = vmul.f32 %v738_v7, %v733_v32 }
 0x186   :  { %v740_v35 = vadd.f32 %v739_v31, %v730_v24 }
 0x188   :  { %v743_v33 = vpop.permute.xlu1 %742 }
 0x189   :  { %v749_v48 = vmul.f32 %v748_v36, %v743_v33 }
 0x18b   :  { %v750_v46 = vadd.f32 %v749_v48, %v740_v35 }
 0x18d   :  { %v763_v16 = vpop.permute.xlu1 %762  ;;  %v760_v61 = vadd.f32 %v759_v13, %v750_v46 }
 0x18e   :  { %v769_v38 = vmul.f32 %v768_v9, %v763_v16 }
 0x190   :  { %v770_v44 = vadd.f32 %v769_v38, %v760_v61 }
 0x192   :  { %v773_v50 = vpop.permute.xlu1 %772 }
 0x193   :  { %v779_v8 = vmul.f32 %v778_v52, %v773_v50 }
 0x195   :  { %v780_v39 = vadd.f32 %v779_v8, %v770_v44 }
 0x197   :  { %v793_v40 = vpop.permute.xlu1 %792  ;;  %v790_v60 = vadd.f32 %v789_v49, %v780_v39 }
 0x198   :  { %v799_v26 = vmul.f32 %v798_v12, %v793_v40 }
 0x19a   :  { %v800_v29 = vadd.f32 %v799_v26, %v790_v60 }
 0x19c   :  { %v803_v34 = vpop.permute.xlu1 %802 }
 0x19d   :  { %v809_v58 = vmul.f32 %v808_v2, %v803_v34 }
 0x19f   :  { %v810_v55 = vadd.f32 %v809_v58, %v800_v29 }
 0x1a1   :  { %v823_v21 = vpop.permute.xlu1 %822  ;;  %v820_v0 = vadd.f32 %v819_v4, %v810_v55 }
 0x1a2   :  { %v829_v22 = vmul.f32 %v828_v10, %v823_v21 }
 0x1a4   :  { %v830_v14 = vadd.f32 %v829_v22, %v820_v0 }
 0x1a6   :  { %831 = vst [vmem:[%s1353_s9] sm:$0x3] %v830_v14 }

</bundles_post_ra>
